<compile_context>
chip_gen: v6e
topology: v6e:2x2x1
jax: 0.10.0
libtpu: 0.0.40
codegen_flags: <defaults>
</compile_context>

<pallas_src>
import functools

import numpy as np
import jax
import jax.numpy as jnp
from jax.experimental import pallas as pl
from jax.experimental.pallas import tpu as pltpu

# ---- module hyper-parameters (synthetic, deterministic) ----
N_FFT = 64
HOP = N_FFT // 4
SAMPLING_RATE = 16000          # unused (no mel filterbank)
POWER = 1                      # magnitude spectrogram
NORMALIZED = True              # divide complex STFT by sqrt(sum(window^2))
NORMS = ("L1", "L2")
MEL = None


def _hann_periodic(n_fft):
    n = np.arange(n_fft, dtype=np.float64)
    return 0.5 * (1.0 - np.cos(2.0 * np.pi * n / n_fft))


def _windowed_dft_mats(n_fft, normalized):
    """Real/imag DFT matrices with the Hann window (and 'window' norm) folded in."""
    n = np.arange(n_fft, dtype=np.float64)
    f = np.arange(n_fft // 2 + 1, dtype=np.float64)
    ang = 2.0 * np.pi * np.outer(n, f) / n_fft            # (n_fft, n_freq)
    win = _hann_periodic(n_fft)
    scale = 1.0 / np.sqrt(np.sum(win ** 2)) if normalized else 1.0
    wcos = (win[:, None] * np.cos(ang)) * scale            # real-part basis
    wsin = (win[:, None] * (-np.sin(ang))) * scale         # imag-part basis
    return wcos, wsin


def _frame_indices(T, n_fft, hop):
    n_frames = 1 + (T - n_fft) // hop
    starts = np.arange(n_frames) * hop
    return starts[:, None] + np.arange(n_fft)[None, :], n_frames  # (n_frames, n_fft)


def _frame_no_gather(sig, n_fft, hop, n_frames):
    """(B, T) -> (B, n_frames, n_fft) frames (center=False) in hop-phase-grouped order.

    Uses only static slices + reshapes + one concatenate (no XLA gather, no
    interleaving transpose).  Frame order differs from natural order, but the
    spectral loss is a mean over all frames, so order is irrelevant — both x and
    y go through the same path, so rows stay paired.
    """
    B = sig.shape[0]
    n_phase = n_fft // hop
    parts = []
    for j in range(n_phase):
        if j >= n_frames:
            break
        n_j = (n_frames - 1 - j) // n_phase + 1
        sl = sig[:, j * hop: j * hop + n_j * n_fft]         # contiguous slice
        parts.append(sl.reshape(B, n_j, n_fft))             # free reshape
    return parts[0] if len(parts) == 1 else jnp.concatenate(parts, axis=1)


# -------------------- Pallas kernel --------------------
def _make_kernel(power, use_l1, use_l2, n_fft):
    nl = 2 * n_fft          # packed spec lanes: [0, n_fft) = x, [n_fft, 2*n_fft) = y

    def kernel(slab_ref, basis_ref, out_ref):
        i = pl.program_id(1)                                # reduction (inner) axis

        @pl.when(i == 0)
        def _init():
            out_ref[...] = jnp.zeros_like(out_ref)

        # One block-diagonal MXU matmul for both signals, f32 accumulate:
        # z lanes = [x·cos | y·cos | x·sin | y·sin], each quarter n_fft wide.
        z = jnp.dot(slab_ref[...], basis_ref[...],
                    preferred_element_type=jnp.float32)     # (tm, 4*n_fft)
        z2 = z * z
        mag2 = z2[:, :nl] + z2[:, nl:]                      # (tm, nl): px | py, lane-dense

        if power == 1:
            # forward only; a backward pass would need an eps clamp before sqrt(0)
            spec = jnp.sqrt(mag2)
        elif power == 2:
            spec = mag2
        else:
            spec = mag2 ** (power / 2.0)

        # Lane roll swaps the x/y halves: d holds (sy-sx) in one half and (sx-sy)
        # in the other, so |d| and d*d are the L1/L2 integrands in both halves.
        d = pltpu.roll(spec, shift=n_fft, axis=1) - spec
        mask = jax.lax.broadcasted_iota(jnp.int32, (1, nl), 1) < n_fft
        if use_l1 and use_l2:
            upd = jnp.where(mask, jnp.abs(d), d * d)        # |diff| | diff^2
        elif use_l1:
            upd = jnp.where(mask, jnp.abs(d), 0.0)
        else:
            upd = jnp.where(mask, 0.0, d * d)

        # Row-reduce the tile and accumulate into the resident output block
        # (broadcast over the 8 sublanes; glue reads sublane 0 only).
        out_ref[...] += jnp.sum(upd, axis=0, keepdims=True)[None]

    return kernel


@functools.partial(jax.jit, static_argnames=("n_fft", "hop", "power", "normalized",
                                              "norms", "tile_m", "frames_dtype"))
def spectral_distance(x, y, *, n_fft=N_FFT, hop=HOP, power=POWER,
                      normalized=NORMALIZED, norms=NORMS,
                      tile_m=4096, frames_dtype=jnp.bfloat16):
    if isinstance(norms, str):
        norms = (norms,)
    for nrm in norms:
        if nrm not in ("L1", "L2"):
            raise ValueError(f"Norm must be either L1 or L2, got {nrm}")
    use_l1 = "L1" in norms
    use_l2 = "L2" in norms
    if power is None:
        raise NotImplementedError("power=None (complex spectrogram) not implemented")

    B, T = x.shape
    assert T >= n_fft, "need at least one frame (center=False)"
    assert hop == n_fft // 4 and n_fft % 4 == 0
    assert (2 * n_fft) % 128 == 0, "lane-dense packing requires n_fft % 64 == 0"
    n_freq = n_fft // 2 + 1
    n_frames = 1 + (T - n_fft) // hop
    M = B * n_frames
    kw = 2 * n_fft          # slab lane width (x | y)
    nw = 2 * kw             # matmul output lane width

    # Glue: gather-free framing, then pack x|y into one lane-dense slab.
    xf = _frame_no_gather(x, n_fft, hop, n_frames)           # (B, n_frames, n_fft)
    yf = _frame_no_gather(y, n_fft, hop, n_frames)
    slab = jnp.concatenate([xf, yf], axis=-1).reshape(M, kw).astype(frames_dtype)

    # Row tiling (zero-padded rows are loss-neutral: divide by the true count).
    tm = int(min(tile_m, -(-M // 16) * 16))
    tm = -(-tm // 16) * 16                                   # bf16 sublane packing
    grid_m = -(-M // tm)
    P = 2 if grid_m >= 2 else 1                              # v7x: both TensorCores
    grid_m = -(-grid_m // P) * P
    inner = grid_m // P
    M_pad = grid_m * tm
    if M_pad > M:
        slab = jnp.pad(slab, ((0, M_pad - M), (0, 0)))

    # Block-diagonal packed windowed-DFT basis (kw, nw), bf16:
    #   lanes [0, n_fft)        = x·cos   lanes [n_fft, 2n_fft)  = y·cos
    #   lanes [2n_fft, 3n_fft)  = x·sin   lanes [3n_fft, 4n_fft) = y·sin
    # Padded frequency lanes ([n_freq, n_fft) of each quarter) are exactly zero,
    # so they contribute 0 to the loss (keep this invariant if repacking).
    wcos, wsin = _windowed_dft_mats(n_fft, normalized)
    basis_np = np.zeros((kw, nw), np.float32)
    basis_np[:n_fft, 0:n_freq] = wcos
    basis_np[n_fft:, n_fft:n_fft + n_freq] = wcos
    basis_np[:n_fft, kw:kw + n_freq] = wsin
    basis_np[n_fft:, kw + n_fft:kw + n_fft + n_freq] = wsin
    basis = jnp.asarray(basis_np, frames_dtype)

    inv_count = 1.0 / float(B * n_frames * n_freq)
    kernel = _make_kernel(power, use_l1, use_l2, n_fft)

    bytes_per = np.dtype(frames_dtype).itemsize
    flops = int(2 * M_pad * kw * nw)                         # one matmul, 2 flops/MAC
    transcendentals = int(M_pad * kw) if power == 1 else 0   # sqrt per magnitude elem
    bytes_accessed = int(M_pad * kw * bytes_per + kw * nw * bytes_per + P * 8 * kw * 4)

    partials = pl.pallas_call(
        kernel,
        out_shape=jax.ShapeDtypeStruct((P, 8, kw), jnp.float32),
        grid_spec=pltpu.PrefetchScalarGridSpec(
            num_scalar_prefetch=0,
            grid=(P, inner),
            in_specs=[
                pl.BlockSpec((tm, kw), lambda p, i: (p * inner + i, 0)),
                pl.BlockSpec((kw, nw), lambda p, i: (0, 0)),
            ],
            out_specs=pl.BlockSpec((1, 8, kw), lambda p, i: (p, 0, 0)),
        ),
        compiler_params=pltpu.CompilerParams(
            dimension_semantics=("parallel", "arbitrary"),
            vmem_limit_bytes=32 * 1024 * 1024),
        cost_estimate=pl.CostEstimate(flops=flops,
                                      transcendentals=transcendentals,
                                      bytes_accessed=bytes_accessed),
    )(slab, basis)

    # Per-core partials: L1 sums in lanes [0, n_fft), L2 sums in lanes [n_fft, 2n_fft)
    # (unrequested norm lanes are zeroed in-kernel), sublane 0 only.
    return jnp.sum(partials[:, 0, :]) * inv_count


# -------------------- pure-NumPy reference (float64) --------------------
def _reference(x, y, n_fft=N_FFT, hop=HOP, power=POWER,
               normalized=NORMALIZED, norms=NORMS):
    B, T = x.shape
    idx, n_frames = _frame_indices(T, n_fft, hop)
    wcos, wsin = _windowed_dft_mats(n_fft, normalized)

    def spec(sig):
        fr = sig[:, idx].reshape(B * n_frames, n_fft)      # (M, n_fft)
        re = fr @ wcos
        im = fr @ wsin
        mag2 = re * re + im * im
        return np.sqrt(mag2) if power == 1 else mag2 ** (power / 2.0)

    sx, sy = spec(x), spec(y)
    diff = sy - sx
    dist = 0.0
    for nrm in norms:
        if nrm == "L1":
            dist += np.mean(np.abs(diff))
        else:
            dist += np.mean(diff * diff)
    return float(dist)


if __name__ == "__main__":
    key = jax.random.PRNGKey(0)
    kx, ky = jax.random.split(key)
    B, T = 2, 256                                          # n_frames = 13, n_freq = 33
    x = jax.random.normal(kx, (B, T), jnp.float32)
    y = jax.random.normal(ky, (B, T), jnp.float32)

    out = spectral_distance(x, y)
    out = jax.block_until_ready(out)

    ref = _reference(np.asarray(x, np.float64), np.asarray(y, np.float64))
    # bf16 frames/basis (f32 MXU accumulate + f32 loss math) -> loss-level error ~1e-4.
    np.testing.assert_allclose(float(out), ref, rtol=3e-3, atol=3e-4)
    print("KERNEL_OK")
</pallas_src>

<mosaic_0001>
module attributes {stable_mosaic.version = 11 : i64} {
  func.func @kernel(%arg0: i32, %arg1: i32, %arg2: memref<32x128xbf16, #tpu.memory_space<vmem>>, %arg3: memref<128x256xbf16, #tpu.memory_space<vmem>>, %arg4: memref<1x8x128xf32, #tpu.memory_space<vmem>>) attributes {dimension_semantics = [#tpu.dimension_semantics<parallel>, #tpu.dimension_semantics<arbitrary>], iteration_bounds = array<i64: 1, 1>, scalar_prefetch = 0 : i64, scratch_operands = 0 : i64, tpu.core_type = #tpu.core_type<tc>, window_params = [{transform_indices = @transform_0, window_bounds = array<i64: 32, 128>}, {pipeline_mode = #tpu.pipeline_mode<synchronous>, transform_indices = @transform_1, window_bounds = array<i64: 128, 256>}, {transform_indices = @transform_2, window_bounds = array<i64: 1, 8, 128>}]} {
    %c0_i32 = arith.constant 0 : i32
    %0 = arith.cmpi eq, %arg1, %c0_i32 : i32
    %1 = arith.extui %0 : i1 to i32
    %c0_i32_0 = arith.constant 0 : i32
    %2 = arith.cmpi ne, %1, %c0_i32_0 : i32
    scf.if %2 {
      %cst_12 = arith.constant 0.000000e+00 : f32
      %28 = vector.broadcast %cst_12 : f32 to vector<1x8x128xf32>
      %c0_13 = arith.constant 0 : index
      %c0_14 = arith.constant 0 : index
      %c0_15 = arith.constant 0 : index
      %29 = vector.load %arg4[%c0_13, %c0_14, %c0_15] : memref<1x8x128xf32, #tpu.memory_space<vmem>>, vector<1x8x128xf32>
      tpu.vector_store %arg4[%c0_13, %c0_14, %c0_15], %28 {strides = array<i32>} : memref<1x8x128xf32, #tpu.memory_space<vmem>>, vector<1x8x128xf32>,
    } else {
    }
    %c0 = arith.constant 0 : index
    %c0_1 = arith.constant 0 : index
    %3 = vector.load %arg2[%c0, %c0_1] : memref<32x128xbf16, #tpu.memory_space<vmem>>, vector<32x128xbf16>
    %c0_2 = arith.constant 0 : index
    %c0_3 = arith.constant 0 : index
    %4 = vector.load %arg3[%c0_2, %c0_3] : memref<128x256xbf16, #tpu.memory_space<vmem>>, vector<128x256xbf16>
    %cst = arith.constant dense<0.000000e+00> : vector<32x256xf32>
    %5 = tpu.matmul %3, %4, %cst {dimension_numbers = #tpu.dot_dimension_numbers<[1], [0], [0], [1], [0, 0, 1, 1], [], []>} : vector<32x128xbf16>, vector<128x256xbf16>, vector<32x256xf32> -> vector<32x256xf32>
    %6 = arith.mulf %5, %5 : vector<32x256xf32>
    %7 = vector.extract_strided_slice %6 {offsets = [0, 0], sizes = [32, 128], strides = [1, 1]} : vector<32x256xf32> to vector<32x128xf32>
    %8 = vector.extract_strided_slice %6 {offsets = [0, 128], sizes = [32, 128], strides = [1, 1]} : vector<32x256xf32> to vector<32x128xf32>
    %9 = arith.addf %7, %8 : vector<32x128xf32>
    %10 = math.sqrt %9 : vector<32x128xf32>
    %c64_i32 = arith.constant 64 : i32
    %11 = tpu.dynamic_rotate %10 by %c64_i32 dim 1 : vector<32x128xf32>, i32 -> vector<32x128xf32>
    %12 = arith.subf %11, %10 : vector<32x128xf32>
    %13 = tpu.iota {dimensions = array<i32: 1>} : vector<1x128xi32>
    %c64_i32_4 = arith.constant 64 : i32
    %14 = vector.broadcast %c64_i32_4 : i32 to vector<1x128xi32>
    %15 = arith.cmpi slt, %13, %14 : vector<1x128xi32>
    %16 = math.absf %12 : vector<32x128xf32>
    %17 = arith.mulf %12, %12 : vector<32x128xf32>
    %18 = vector.shape_cast %15 : vector<1x128xi1> to vector<1x128xi1>
    %19 = vector.broadcast %18 : vector<1x128xi1> to vector<32x128xi1>
    %20 = arith.select %19, %16, %17 : vector<32x128xi1>, vector<32x128xf32>
    %c0_5 = arith.constant 0 : index
    %c0_6 = arith.constant 0 : index
    %c0_7 = arith.constant 0 : index
    %21 = vector.load %arg4[%c0_5, %c0_6, %c0_7] : memref<1x8x128xf32, #tpu.memory_space<vmem>>, vector<1x8x128xf32>
    %cst_8 = arith.constant dense<0.000000e+00> : vector<128xf32>
    %22 = vector.multi_reduction <add>, %20, %cst_8 [0] : vector<32x128xf32> to vector<128xf32>
    %23 = vector.shape_cast %22 : vector<128xf32> to vector<1x128xf32>
    %24 = vector.shape_cast %23 : vector<1x128xf32> to vector<1x1x128xf32>
    %25 = vector.broadcast %24 : vector<1x1x128xf32> to vector<1x8x128xf32>
    %26 = arith.addf %21, %25 : vector<1x8x128xf32>
    %c0_9 = arith.constant 0 : index
    %c0_10 = arith.constant 0 : index
    %c0_11 = arith.constant 0 : index
    %27 = vector.load %arg4[%c0_9, %c0_10, %c0_11] : memref<1x8x128xf32, #tpu.memory_space<vmem>>, vector<1x8x128xf32>
    tpu.vector_store %arg4[%c0_9, %c0_10, %c0_11], %26 {strides = array<i32>} : memref<1x8x128xf32, #tpu.memory_space<vmem>>, vector<1x8x128xf32>,
    return
  }
  func.func @transform_0(%arg0: i32, %arg1: i32) -> (i32, i32) {
    %c1_i32 = arith.constant 1 : i32
    %0 = arith.muli %arg0, %c1_i32 : i32
    %1 = arith.addi %0, %arg1 : i32
    %c0_i32 = arith.constant 0 : i32
    %c0_i32_0 = arith.constant 0 : i32
    return %1, %c0_i32 : i32, i32
  }
  func.func @transform_1(%arg0: i32, %arg1: i32) -> (i32, i32) {
    %c0_i32 = arith.constant 0 : i32
    %c0_i32_0 = arith.constant 0 : i32
    %c0_i32_1 = arith.constant 0 : i32
    return %c0_i32, %c0_i32_0 : i32, i32
  }
  func.func @transform_2(%arg0: i32, %arg1: i32) -> (i32, i32, i32) {
    %c0_i32 = arith.constant 0 : i32
    %c0_i32_0 = arith.constant 0 : i32
    %c0_i32_1 = arith.constant 0 : i32
    return %arg0, %c0_i32, %c0_i32_0 : i32, i32, i32
  }
}

</mosaic_0001>

<bundles_post_ra>
// kernel: spectral_distance.1
= control target key start
LH: loop header
LB: loop body
LE: loop exit
PB: predicated region body
PF: predicated region fallthrough
CT: control target
= control target key end

     0   :  { %v366_v1 = vmov 0   ;;  %v256_v59 = vlaneseq  ;;  %s440_s1 = inlined_call_operand.vmem [shape: bf16[128,256], index: 1, kind: input, shape index: {}]   ;;  %s441_s0 = inlined_call_operand.vmem [shape: bf16[32,128], index: 0, kind: input, shape index: {}]   ;;  %s442_s2 = inlined_call_operand.vmem [shape: f32[1,8,128], index: 2, kind: output, shape index: {}]  }
   0x1   :  { %v332_v0 = vld [vmem:[%s440_s1 + $0x74] ss:$8 sps:$4 sm:$0xff]   ;;  %183 = vmatprep.mubr.bf16.mxu0 %v366_v1  ;;  %193 = vmatprep.mubr.bf16.mxu1 %v366_v1  ;;  %v334_v2 = vld [vmem:[%s440_s1 + $0x70] ss:$8 sps:$4 sm:$0xff]   ;;  %v335_v3 = vld [vmem:[%s440_s1 + $0x64] ss:$8 sps:$4 sm:$0xff]  }
   0x2   :  { %151 = vmatprep.subr.bf16.mxu0 %v332_v0  ;;  %313 = vmatprep.subr.bf16.mxu1 %v332_v0  ;;  %v337_v4 = vld [vmem:[%s440_s1 + $0x60] ss:$8 sps:$4 sm:$0xff]   ;;  %v338_v5 = vld [vmem:[%s440_s1 + $0x54] ss:$8 sps:$4 sm:$0xff]   ;;  %v340_v6 = vld [vmem:[%s440_s1 + $0x50] ss:$8 sps:$4 sm:$0xff]  }
   0x3   :  { %152 = vmatpush1.bf16.msra.mxu0 %v334_v2  ;;  %321 = vmatpush1.bf16.msra.mxu1 %v334_v2  ;;  %v341_v7 = vld [vmem:[%s440_s1 + $0x44] ss:$8 sps:$4 sm:$0xff]   ;;  %v343_v8 = vld [vmem:[%s440_s1 + $0x40] ss:$8 sps:$4 sm:$0xff]   ;;  %v344_v9 = vld [vmem:[%s440_s1 + $0x34] ss:$8 sps:$4 sm:$0xff]  }
   0x4   :  { %153 = vmatprep.subr.bf16.mxu0 %v335_v3  ;;  %314 = vmatprep.subr.bf16.mxu1 %v335_v3  ;;  %v346_v10 = vld [vmem:[%s440_s1 + $0x30] ss:$8 sps:$4 sm:$0xff]   ;;  %v347_v11 = vld [vmem:[%s440_s1 + $0x24] ss:$8 sps:$4 sm:$0xff]   ;;  %v349_v12 = vld [vmem:[%s440_s1 + $0x20] ss:$8 sps:$4 sm:$0xff]  }
   0x5   :  { %v350_v13 = vld [vmem:[%s440_s1 + $0x14] ss:$8 sps:$4 sm:$0xff]   ;;  %v352_v14 = vld [vmem:[%s440_s1 + $0x10] ss:$8 sps:$4 sm:$0xff]   ;;  %v353_v15 = vld [vmem:[%s440_s1 + $0x4] ss:$8 sps:$4 sm:$0xff]  }
   0x6   :  { %v355_v16 = vld [vmem:[%s440_s1] ss:$8 sps:$4 sm:$0xff]   ;;  %v257_v63 = vand.u32 127, %v256_v59 }
   0x7   :  { %154 = vmatpush1.bf16.msra.mxu0 %v337_v4  ;;  %322 = vmatpush1.bf16.msra.mxu1 %v337_v4  ;;  %v356_v17 = vld [vmem:[%s441_s0] sm:$0xff]   ;;  %v357_v18 = vld [vmem:[%s441_s0 + $0x8] sm:$0xff]   ;;  %s367_s0 = smov 64  }
   0x8   :  { %155 = vmatprep.subr.bf16.mxu0 %v338_v5  ;;  %315 = vmatprep.subr.bf16.mxu1 %v338_v5  ;;  %vm258_vm8 = vcmp.lt.s32.totalorder %v257_v63, 64 }
   0xb   :  { %156 = vmatpush1.bf16.msra.mxu0 %v340_v6  ;;  %323 = vmatpush1.bf16.msra.mxu1 %v340_v6 }
   0xc   :  { %157 = vmatprep.subr.bf16.mxu0 %v341_v7  ;;  %316 = vmatprep.subr.bf16.mxu1 %v341_v7 }
   0xf   :  { %158 = vmatpush1.bf16.msra.mxu0 %v343_v8  ;;  %324 = vmatpush1.bf16.msra.mxu1 %v343_v8 }
  0x10   :  { %159 = vmatprep.subr.bf16.mxu0 %v344_v9  ;;  %317 = vmatprep.subr.bf16.mxu1 %v344_v9 }
  0x13   :  { %160 = vmatpush1.bf16.msra.mxu0 %v346_v10  ;;  %325 = vmatpush1.bf16.msra.mxu1 %v346_v10 }
  0x14   :  { %161 = vmatprep.subr.bf16.mxu0 %v347_v11  ;;  %318 = vmatprep.subr.bf16.mxu1 %v347_v11 }
  0x17   :  { %162 = vmatpush1.bf16.msra.mxu0 %v349_v12  ;;  %326 = vmatpush1.bf16.msra.mxu1 %v349_v12 }
  0x18   :  { %163 = vmatprep.subr.bf16.mxu0 %v350_v13  ;;  %319 = vmatprep.subr.bf16.mxu1 %v350_v13 }
  0x1b   :  { %164 = vmatpush1.bf16.msra.mxu0 %v352_v14  ;;  %327 = vmatpush1.bf16.msra.mxu1 %v352_v14 }
  0x1c   :  { %165 = vmatprep.subr.bf16.mxu0 %v353_v15  ;;  %320 = vmatprep.subr.bf16.mxu1 %v353_v15 }
  0x1f   :  { %166 = vmatpush1.bf16.msra.mxu0 %v355_v16  ;;  %328 = vmatpush1.bf16.msra.mxu1 %v355_v16 }
  0x22   :  { %184 = vmatmul.mubr.bf16.vlgmr.msra.gmra.mxu0 %v356_v17  ;;  %194 = vmatmul.mubr.bf16.vlgmr.msra.gmra.mxu1 %v357_v18 }
  0xe2   :  { %v185_v19 = vpop.f32.mrf.mxu0  ;;  %v195_v20 = vpop.f32.mrf.mxu1 }
  0xe3   :  { %v208_v21 = vmul.f32 %v195_v20, %v195_v20  ;;  %v204_v24 = vmul.f32 %v185_v19, %v185_v19 }
  0xe4   :  { %v187_v22 = vpop.f32.mrf.mxu0  ;;  %v197_v23 = vpop.f32.mrf.mxu1 }
  0xe5   :  { %v205_v25 = vmul.f32 %v187_v22, %v187_v22  ;;  %v209_v26 = vmul.f32 %v197_v23, %v197_v23 }
  0xe6   :  { %v189_v27 = vpop.f32.mrf.mxu0  ;;  %v199_v28 = vpop.f32.mrf.mxu1 }
  0xe7   :  { %v212_v29 = vadd.f32 %v205_v25, %v204_v24  ;;  %v214_v30 = vadd.f32 %v209_v26, %v208_v21  ;;  %v206_v31 = vmul.f32 %v189_v27, %v189_v27  ;;  %v210_v34 = vmul.f32 %v199_v28, %v199_v28 }
  0xe8   :  { %v191_v32 = vpop.f32.mrf.mxu0  ;;  %v201_v33 = vpop.f32.mrf.mxu1 }
  0xe9   :  { %358 = vrsqrt.f32 %v212_v29  ;;  %v207_v35 = vmul.f32 %v191_v32, %v191_v32  ;;  %v211_v36 = vmul.f32 %v201_v33, %v201_v33  ;;  %vm218_vm0 = vcmp.eq.f32.partialorder %v212_v29, inf }
  0xea   :  { %360 = vrsqrt.f32 %v214_v30  ;;  %v221_v43 = vand.u32 2147483648, %v212_v29  ;;  %vm232_vm1 = vcmp.eq.f32.partialorder %v214_v30, inf  ;;  %v235_v44 = vand.u32 2147483648, %v214_v30 }
  0xeb   :  { %v213_v37 = vadd.f32 %v207_v35, %v206_v31  ;;  %v215_v38 = vadd.f32 %v211_v36, %v210_v34  ;;  %vm220_vm2 = vcmp.eq.f32.partialorder %v212_v29, 0.0  ;;  %vm234_vm3 = vcmp.eq.f32.partialorder %v214_v30, 0.0 }
  0xed   :  { %362 = vrsqrt.f32 %v213_v37  ;;  %vm225_vm4 = vcmp.eq.f32.partialorder %v213_v37, inf  ;;  %v228_v53 = vand.u32 2147483648, %v213_v37  ;;  %vm239_vm5 = vcmp.eq.f32.partialorder %v215_v38, inf }
  0xee   :  { %364 = vrsqrt.f32 %v215_v38  ;;  %v242_v54 = vand.u32 2147483648, %v215_v38  ;;  %vm227_vm6 = vcmp.eq.f32.partialorder %v213_v37, 0.0  ;;  %vm241_vm7 = vcmp.eq.f32.partialorder %v215_v38, 0.0 }
  0xf6   :  { %v359_v39 = vpop.eup %358 }
  0xf7   :  { %v361_v40 = vpop.eup %360  ;;  %v217_v41 = vmul.f32 %v359_v39, %v212_v29 }
  0xf8   :  { %v231_v42 = vmul.f32 %v361_v40, %v214_v30 }
  0xf9   :  { %v219_v45 = vsel %vm218_vm0, %v212_v29, %v217_v41 }
  0xfa   :  { %v363_v46 = vpop.eup %362  ;;  %v233_v47 = vsel %vm232_vm1, %v214_v30, %v231_v42  ;;  %v222_v48 = vsel %vm220_vm2, %v221_v43, %v219_v45 }
  0xfb   :  { %v365_v49 = vpop.eup %364  ;;  %v236_v50 = vsel %vm234_vm3, %v235_v44, %v233_v47  ;;  %244 = vrot.lane.b32.xlu0 %v222_v48, %s367_s0  ;;  %v224_v51 = vmul.f32 %v363_v46, %v213_v37 }
  0xfc   :  { %248 = vrot.lane.b32.xlu1 %v236_v50, %s367_s0  ;;  %v238_v52 = vmul.f32 %v365_v49, %v215_v38 }
  0xfd   :  { %v226_v55 = vsel %vm225_vm4, %v213_v37, %v224_v51 }
  0xfe   :  { %v240_v56 = vsel %vm239_vm5, %v215_v38, %v238_v52  ;;  %v229_v57 = vsel %vm227_vm6, %v228_v53, %v226_v55 }
  0xff   :  { %v243_v58 = vsel %vm241_vm7, %v242_v54, %v240_v56  ;;  %246 = vrot.lane.b32.xlu0 %v229_v57, %s367_s0 }
 0x100   :  { %250 = vrot.lane.b32.xlu1 %v243_v58, %s367_s0 }
 0x16d   :  { %v245_v60 = vpop.permute.xlu0 %244 }
 0x16e   :  { %v249_v61 = vpop.permute.xlu1 %248  ;;  %v252_v62 = vsub.f32 %v245_v60, %v222_v48 }
 0x16f   :  { %v254_v0 = vsub.f32 %v249_v61, %v236_v50 }
 0x170   :  { %v259_v2 = vand.u32 2147483647, %v252_v62  ;;  %v263_v3 = vmul.f32 %v252_v62, %v252_v62 }
 0x171   :  { %v247_v1 = vpop.permute.xlu0 %246  ;;  %v261_v7 = vand.u32 2147483647, %v254_v0  ;;  %v265_v8 = vmul.f32 %v254_v0, %v254_v0 }
 0x172   :  { %v251_v4 = vpop.permute.xlu1 %250  ;;  %v253_v5 = vsub.f32 %v247_v1, %v229_v57  ;;  %v269_v11 = vsel %vm258_vm8, %v259_v2, %v263_v3 }
 0x173   :  { %v255_v6 = vsub.f32 %v251_v4, %v243_v58  ;;  %v271_v16 = vsel %vm258_vm8, %v261_v7, %v265_v8 }
 0x174   :  { %v260_v9 = vand.u32 2147483647, %v253_v5  ;;  %v264_v10 = vmul.f32 %v253_v5, %v253_v5 }
 0x175   :  { %v262_v12 = vand.u32 2147483647, %v255_v6  ;;  %v266_v13 = vmul.f32 %v255_v6, %v255_v6 }
 0x176   :  { %v270_v14 = vsel %vm258_vm8, %v260_v9, %v264_v10 }
 0x177   :  { %v274_v15 = vadd.f32 %v270_v14, %v269_v11  ;;  %v272_v18 = vsel %vm258_vm8, %v262_v12, %v266_v13 }
 0x179   :  { %v275_v17 = vadd.f32 %v274_v15, %v271_v16 }
 0x17b   :  { %v276_v19 = vadd.f32 %v275_v17, %v272_v18 }
 0x17d   :  { %v277_v20 = vrot.slane %v276_v19, 4 }
 0x17f   :  { %v278_v21 = vadd.f32 %v277_v20, %v276_v19 }
 0x181   :  { %v279_v22 = vrot.slane %v278_v21, 2 }
 0x183   :  { %v280_v23 = vadd.f32 %v279_v22, %v278_v21 }
 0x185   :  { %v281_v24 = vrot.slane %v280_v23, 1 }
 0x187   :  { %v282_v25 = vadd.f32 %v281_v24, %v280_v23 }
 0x189   :  { %284 = vst [vmem:[%s442_s2] sm:$0xff] %v282_v25 }

</bundles_post_ra>
